<compile_context>
chip_gen: v7x
topology: tpu7x:2x2x1
jax: 0.10.0
libtpu: 0.0.40
codegen_flags: <defaults>
</compile_context>

<pallas_src>
import jax
import jax.numpy as jnp
import numpy as np
from jax.experimental import pallas as pl
from jax.experimental.pallas import tpu as pltpu


# ----------------------------------------------------------------------------
# Plain-JAX bidirectional LSTM encoders (PyTorch nn.LSTM semantics, eval mode).
# ----------------------------------------------------------------------------
def _lstm_dir(x, lens, w_ih, w_hh, b_ih, b_hh, reverse=False):
    """Single-direction LSTM over padded batch-first input with length masking.

    x: [B, T, D], lens: [B] int32.  Returns outputs [B, T, H] (zeros at padding),
    matching pack_padded_sequence / pad_packed_sequence behaviour.
    """
    B, T, D = x.shape
    H = w_hh.shape[1]
    t_idx = jnp.arange(T, dtype=jnp.int32)
    mask = t_idx[None, :] < lens[:, None]                      # [B, T]

    if reverse:
        # reverse each sequence within its own length
        idx = jnp.clip(lens[:, None] - 1 - t_idx[None, :], 0, T - 1)
        xs = jnp.take_along_axis(x, idx[:, :, None], axis=1)
    else:
        xs = x

    def step(carry, inp):
        h, c = carry
        x_t, m_t = inp                                          # [B, D], [B]
        gates = x_t @ w_ih.T + b_ih + h @ w_hh.T + b_hh
        i, f, g, o = jnp.split(gates, 4, axis=-1)               # PyTorch gate order
        i = jax.nn.sigmoid(i)
        f = jax.nn.sigmoid(f)
        g = jnp.tanh(g)
        o = jax.nn.sigmoid(o)
        c_new = f * c + i * g
        h_new = o * jnp.tanh(c_new)
        m = m_t[:, None]
        h = jnp.where(m, h_new, h)
        c = jnp.where(m, c_new, c)
        out = jnp.where(m, h_new, 0.0)
        return (h, c), out

    h0 = jnp.zeros((B, H), x.dtype)
    c0 = jnp.zeros((B, H), x.dtype)
    _, outs = jax.lax.scan(step, (h0, c0),
                           (jnp.swapaxes(xs, 0, 1), mask.T))
    outs = jnp.swapaxes(outs, 0, 1)                             # [B, T, H]

    if reverse:
        idx = jnp.clip(lens[:, None] - 1 - t_idx[None, :], 0, T - 1)
        outs = jnp.take_along_axis(outs, idx[:, :, None], axis=1)
        outs = jnp.where(mask[:, :, None], outs, 0.0)
    return outs


def bilstm_encode(params, x, lens):
    """num_layers bidirectional LSTM, batch_first, returns [B, T, 2*H]."""
    # TODO(synk): the recurrent LSTM has no clean Pallas equivalent; it stays as a
    # lax.scan and will dominate end-to-end runtime, not the attention kernel below.
    h = x
    for layer_p in params:
        fwd = _lstm_dir(h, lens, **layer_p[0], reverse=False)
        bwd = _lstm_dir(h, lens, **layer_p[1], reverse=True)
        h = jnp.concatenate([fwd, bwd], axis=-1)
        # TODO(synk): inter-layer dropout (dr=0.3) only applies in training; eval => no-op.
    return h


def init_lstm_params(key, input_size, hidden, num_layers, scale=0.1):
    params = []
    for layer in range(num_layers):
        in_sz = input_size if layer == 0 else 2 * hidden
        layer_p = []
        for _d in range(2):  # forward, backward
            key, k1, k2, k3, k4 = jax.random.split(key, 5)
            layer_p.append(dict(
                w_ih=jax.random.normal(k1, (4 * hidden, in_sz), jnp.float32) * scale,
                w_hh=jax.random.normal(k2, (4 * hidden, hidden), jnp.float32) * scale,
                b_ih=jax.random.normal(k3, (4 * hidden,), jnp.float32) * scale,
                b_hh=jax.random.normal(k4, (4 * hidden,), jnp.float32) * scale,
            ))
        params.append(layer_p)
    return params, key


def encode_hpu(enc_h_params, wemb_hpu, l_hpu, l_hs):
    """Encode each header-token sequence, take output at its last valid step,
    then regroup per batch element into [B, max(l_hs), hS] (zeros padding)."""
    l_hpu_arr = jnp.asarray(l_hpu, jnp.int32)
    out_all = bilstm_encode(enc_h_params, wemb_hpu, l_hpu_arr)  # [N_hpu, mL_hpu, hS]
    n = wemb_hpu.shape[0]
    last = out_all[jnp.arange(n), l_hpu_arr - 1]                # [N_hpu, hS]
    B, mL_hs, hS = len(l_hs), max(l_hs), last.shape[-1]
    wenc_hs = jnp.zeros((B, mL_hs, hS), jnp.float32)
    st = 0
    for i, l1 in enumerate(l_hs):
        wenc_hs = wenc_hs.at[i, :l1].set(last[st:st + l1])
        st += l1
    return wenc_hs


# ----------------------------------------------------------------------------
# Pallas kernel: attention + softmax + context pooling + output scoring.
# ----------------------------------------------------------------------------
def wcp_kernel(wn_ref, whs_ref,                 # bf16 [BB,T_n,hS], [BB,T_hs,hS]
               nbias_ref, hbias_ref,            # f32  [BB,1,T_n],  [BB,1,T_hs]
               w_att_ref, w_c_t_ref, w_hs_t_ref,  # bf16 [hS,hS] each
               b_att_ref, b_c_ref, b_hs_ref,    # f32  [1,hS] each
               w_out_c_ref, w_out_hs_ref,       # f32  [1,hS] each (VPU path)
               score_ref):                      # f32  [BB,T_hs] (lane-dense)
    BB, T_hs, hS = whs_ref.shape
    T_n = wn_ref.shape[1]

    wn = wn_ref[...]                            # bf16 [BB, T_n, hS]
    whs = whs_ref[...]                          # bf16 [BB, T_hs, hS]
    whs2 = whs.reshape(BB * T_hs, hS)           # flatten batch into the MXU M dim

    # --- attention, rewritten as (whs @ W_att) @ wn^T + whs·b_att -------------
    # (projects the small T_hs side instead of T_n; identical math)
    q = jnp.dot(whs2, w_att_ref[...], preferred_element_type=jnp.float32)
    q = q.reshape(BB, T_hs, hS).astype(jnp.bfloat16)
    att = jax.lax.dot_general(q, wn, (((2,), (2,)), ((0,), (0,))),
                              preferred_element_type=jnp.float32)   # [BB,T_hs,T_n]
    hsb = jnp.sum(whs * b_att_ref[...].reshape(1, 1, hS),
                  axis=-1, keepdims=True)                            # [BB,T_hs,1] f32
    # nbias carries 0 / -1e10 per question position (length mask), built host-side
    att = att + hsb + nbias_ref[...]

    # --- softmax over question positions (f32; divide on the EUP) ------------
    m = jnp.max(att, axis=-1, keepdims=True)
    e = jnp.exp(att - m)
    p = e * pl.reciprocal(jnp.sum(e, axis=-1, keepdims=True), approx=True)

    # --- context pooling: c_n = p @ wn (batched) ------------------------------
    c_n = jax.lax.dot_general(p.astype(jnp.bfloat16), wn,
                              (((2,), (1,)), ((0,), (0,))),
                              preferred_element_type=jnp.float32)    # [BB,T_hs,hS]

    # --- output scoring: tanh(W_c c_n)·w_out_c + tanh(W_hs whs)·w_out_hs + b_out
    c2 = c_n.reshape(BB * T_hs, hS).astype(jnp.bfloat16)
    y1 = jnp.tanh(jnp.dot(c2, w_c_t_ref[...],
                          preferred_element_type=jnp.float32) + b_c_ref[...])
    y2 = jnp.tanh(jnp.dot(whs2, w_hs_t_ref[...],
                          preferred_element_type=jnp.float32) + b_hs_ref[...])
    y1 = y1.reshape(BB, T_hs, hS)
    y2 = y2.reshape(BB, T_hs, hS)
    # N=1 output projection done on VPU (multiply + lane reduce) — frees the MXU.
    sc = (jnp.sum(y1 * w_out_c_ref[...].reshape(1, 1, hS), axis=-1)
          + jnp.sum(y2 * w_out_hs_ref[...].reshape(1, 1, hS), axis=-1)
          + hbias_ref[...][:, 0, :])            # hbias = b_out at valid headers, -1e10 past l_hs
    score_ref[...] = sc                          # [BB, T_hs]


def wcp_attention_score(wenc_n, wenc_hs, l_n, l_hs, lin, *, block_b=None):
    B, T_n, hS = wenc_n.shape
    _, T_hs, _ = wenc_hs.shape
    NEG = jnp.float32(-1e10)

    l_n_arr = jnp.asarray(l_n, jnp.int32)
    l_hs_arr = jnp.asarray(l_hs, jnp.int32)

    # Additive length masks built host-side; b_out and the l_hs penalty are folded
    # into hbias, so the kernel needs no (1,1) VMEM block / SMEM scalar for them.
    # (-1e10 + x rounds back to exactly -1e10 in f32 for |x| < 512.)
    nbias = jnp.where(jnp.arange(T_n, dtype=jnp.int32)[None, :] < l_n_arr[:, None],
                      jnp.float32(0.0), NEG)                       # [B, T_n]
    b_out0 = lin['b_out'].astype(jnp.float32).reshape(())
    hbias = jnp.where(jnp.arange(T_hs, dtype=jnp.int32)[None, :] < l_hs_arr[:, None],
                      b_out0, NEG)                                 # [B, T_hs]
    nbias = nbias.reshape(B, 1, T_n)
    hbias = hbias.reshape(B, 1, T_hs)

    # Batch blocking: one grid step handles BB batch elements so the flattened MXU
    # M dimension (BB*T_hs) approaches a full 256-row tile (128+ on v5e).
    if block_b is None:
        block_b = max(1, min(B, -(-256 // max(T_hs, 1))))
    if block_b < B:
        block_b = min(-(-block_b // 8) * 8, B)   # keep (BB, T_hs) output block sublane-aligned
    BB = block_b
    nb = -(-B // BB)
    Bp = nb * BB

    # bf16 on all MXU inputs (halves HBM->VMEM bytes, runs the MXU at native rate);
    # accumulation and all elementwise math stay f32.
    wn = wenc_n.astype(jnp.bfloat16)
    whs = wenc_hs.astype(jnp.bfloat16)
    if Bp != B:
        pad = Bp - B
        wn = jnp.pad(wn, ((0, pad), (0, 0), (0, 0)))
        whs = jnp.pad(whs, ((0, pad), (0, 0), (0, 0)))
        nbias = jnp.pad(nbias, ((0, pad), (0, 0), (0, 0)))
        hbias = jnp.pad(hbias, ((0, pad), (0, 0), (0, 0)))

    w_att = lin['w_att'].astype(jnp.bfloat16)            # used as  whs @ W_att (no transpose)
    w_c_t = lin['w_c'].T.astype(jnp.bfloat16)
    w_hs_t = lin['w_hs'].T.astype(jnp.bfloat16)
    b_att = lin['b_att'].reshape(1, hS).astype(jnp.float32)
    b_c = lin['b_c'].reshape(1, hS).astype(jnp.float32)
    b_hs = lin['b_hs'].reshape(1, hS).astype(jnp.float32)
    w_out_c = lin['w_out'][:, :hS].reshape(1, hS).astype(jnp.float32)
    w_out_hs = lin['w_out'][:, hS:].reshape(1, hS).astype(jnp.float32)

    per_b = lambda b: (b, 0, 0)
    fixed = lambda b: (0, 0)
    grid_spec = pltpu.PrefetchScalarGridSpec(
        num_scalar_prefetch=0,
        grid=(nb,),
        in_specs=[
            pl.BlockSpec((BB, T_n, hS), per_b),
            pl.BlockSpec((BB, T_hs, hS), per_b),
            pl.BlockSpec((BB, 1, T_n), per_b),
            pl.BlockSpec((BB, 1, T_hs), per_b),
            pl.BlockSpec((hS, hS), fixed),
            pl.BlockSpec((hS, hS), fixed),
            pl.BlockSpec((hS, hS), fixed),
            pl.BlockSpec((1, hS), fixed),
            pl.BlockSpec((1, hS), fixed),
            pl.BlockSpec((1, hS), fixed),
            pl.BlockSpec((1, hS), fixed),
            pl.BlockSpec((1, hS), fixed),
        ],
        out_specs=pl.BlockSpec((BB, T_hs), lambda b: (b, 0)),   # lane-dense score rows
    )
    out = pl.pallas_call(
        wcp_kernel,
        out_shape=jax.ShapeDtypeStruct((Bp, T_hs), jnp.float32),
        grid_spec=grid_spec,
        # batch blocks are fully independent -> parallel (2 TensorCores on v7x,
        # no-op on v5e/v6e).  Blocks are tiny; default VMEM limit is ample here —
        # re-budget vmem_limit_bytes if BB/T_n/hS grow on v7x (64 MiB VMEM).
        compiler_params=pltpu.CompilerParams(
            dimension_semantics=("parallel",)),
    )(wn, whs, nbias, hbias, w_att, w_c_t, w_hs_t,
      b_att, b_c, b_hs, w_out_c, w_out_hs)
    return out[:B]                                               # [B, T_hs]


# ----------------------------------------------------------------------------
# Full WCP forward.
# ----------------------------------------------------------------------------
def wcp_forward(params, wemb_n, l_n, wemb_hpu, l_hpu, l_hs):
    wenc_n = bilstm_encode(params['enc_n'], wemb_n, jnp.asarray(l_n, jnp.int32))
    wenc_hs = encode_hpu(params['enc_h'], wemb_hpu, l_hpu, l_hs)
    return wcp_attention_score(wenc_n, wenc_hs, l_n, l_hs, params['lin'])


def wcp_reference(params, wemb_n, l_n, wemb_hpu, l_hpu, l_hs):
    """Pure-JAX f32 reference of the attention/scoring path (for self-check)."""
    lin = params['lin']
    wenc_n = bilstm_encode(params['enc_n'], wemb_n, jnp.asarray(l_n, jnp.int32))
    wenc_hs = encode_hpu(params['enc_h'], wemb_hpu, l_hpu, l_hs)
    att_n = wenc_n @ lin['w_att'].T + lin['b_att']
    att = jnp.einsum('bhd,bnd->bhn', wenc_hs, att_n)
    nmask = jnp.arange(wenc_n.shape[1])[None, None, :] < jnp.asarray(l_n)[:, None, None]
    att = jnp.where(nmask, att, -1e10)
    p = jax.nn.softmax(att, axis=2)
    c_n = jnp.einsum('bhn,bnd->bhd', p, wenc_n)
    y = jnp.concatenate([c_n @ lin['w_c'].T + lin['b_c'],
                         wenc_hs @ lin['w_hs'].T + lin['b_hs']], axis=2)
    score = (jnp.tanh(y) @ lin['w_out'].T + lin['b_out'])[..., 0]
    hmask = jnp.arange(wenc_hs.shape[1])[None, :] < jnp.asarray(l_hs)[:, None]
    return jnp.where(hmask, score, -1e10)


if __name__ == "__main__":
    # small shapes consistent with the module (iS=emb dim, hS even for hS/2 LSTMs)
    iS, hS, lS = 24, 32, 2
    B, T_n = 2, 8
    l_n = [8, 6]
    l_hs = [3, 4]                       # headers per batch element
    l_hpu = [5, 3, 4, 2, 5, 3, 4]       # tokens per header unit (sum(l_hs) units)
    N_hpu, mL_hpu = len(l_hpu), max(l_hpu)

    key = jax.random.PRNGKey(0)
    key, kn, kh = jax.random.split(key, 3)
    wemb_n = jax.random.normal(kn, (B, T_n, iS), jnp.float32)
    wemb_hpu = jax.random.normal(kh, (N_hpu, mL_hpu, iS), jnp.float32)

    # deterministic parameter init
    enc_n_params, key = init_lstm_params(key, iS, hS // 2, lS)
    enc_h_params, key = init_lstm_params(key, iS, hS // 2, lS)
    key, k1, k2, k3, k4, k5, k6, k7, k8 = jax.random.split(key, 9)
    lin = dict(
        w_att=jax.random.normal(k1, (hS, hS), jnp.float32) * 0.1,
        b_att=jax.random.normal(k2, (hS,), jnp.float32) * 0.1,
        w_c=jax.random.normal(k3, (hS, hS), jnp.float32) * 0.1,
        b_c=jax.random.normal(k4, (hS,), jnp.float32) * 0.1,
        w_hs=jax.random.normal(k5, (hS, hS), jnp.float32) * 0.1,
        b_hs=jax.random.normal(k6, (hS,), jnp.float32) * 0.1,
        w_out=jax.random.normal(k7, (1, 2 * hS), jnp.float32) * 0.1,
        b_out=jax.random.normal(k8, (1,), jnp.float32) * 0.1,
    )
    params = dict(enc_n=enc_n_params, enc_h=enc_h_params, lin=lin)

    # show_p_wc plotting branch (matplotlib) is host-side viz and is skipped.
    score = wcp_forward(params, wemb_n, l_n, wemb_hpu, l_hpu, l_hs)
    score = jax.block_until_ready(score)

    ref = jax.block_until_ready(
        wcp_reference(params, wemb_n, l_n, wemb_hpu, l_hpu, l_hs))
    # kernel runs the MXU in bf16 (per v6e/v7x perf guidance) against an f32
    # reference -> loosened but still tight tolerance; masked entries are exactly -1e10.
    np.testing.assert_allclose(np.asarray(score), np.asarray(ref),
                               rtol=5e-2, atol=5e-2)

    assert score.shape == (B, max(l_hs))
    print("KERNEL_OK")
</pallas_src>

<mosaic_0001>
module attributes {stable_mosaic.version = 11 : i64} {
  func.func @wcp_kernel(%arg0: i32, %arg1: memref<2x8x32xbf16, #tpu.memory_space<vmem>>, %arg2: memref<2x4x32xbf16, #tpu.memory_space<vmem>>, %arg3: memref<2x1x8xf32, #tpu.memory_space<vmem>>, %arg4: memref<2x1x4xf32, #tpu.memory_space<vmem>>, %arg5: memref<32x32xbf16, #tpu.memory_space<vmem>>, %arg6: memref<32x32xbf16, #tpu.memory_space<vmem>>, %arg7: memref<32x32xbf16, #tpu.memory_space<vmem>>, %arg8: memref<1x32xf32, #tpu.memory_space<vmem>>, %arg9: memref<1x32xf32, #tpu.memory_space<vmem>>, %arg10: memref<1x32xf32, #tpu.memory_space<vmem>>, %arg11: memref<1x32xf32, #tpu.memory_space<vmem>>, %arg12: memref<1x32xf32, #tpu.memory_space<vmem>>, %arg13: memref<2x4xf32, #tpu.memory_space<vmem>>) attributes {dimension_semantics = [#tpu.dimension_semantics<parallel>], iteration_bounds = array<i64: 1>, scalar_prefetch = 0 : i64, scratch_operands = 0 : i64, tpu.core_type = #tpu.core_type<tc>, window_params = [{transform_indices = @transform_0, window_bounds = array<i64: 2, 8, 32>}, {transform_indices = @transform_1, window_bounds = array<i64: 2, 4, 32>}, {transform_indices = @transform_2, window_bounds = array<i64: 2, 1, 8>}, {transform_indices = @transform_3, window_bounds = array<i64: 2, 1, 4>}, {pipeline_mode = #tpu.pipeline_mode<synchronous>, transform_indices = @transform_4, window_bounds = array<i64: 32, 32>}, {pipeline_mode = #tpu.pipeline_mode<synchronous>, transform_indices = @transform_5, window_bounds = array<i64: 32, 32>}, {pipeline_mode = #tpu.pipeline_mode<synchronous>, transform_indices = @transform_6, window_bounds = array<i64: 32, 32>}, {pipeline_mode = #tpu.pipeline_mode<synchronous>, transform_indices = @transform_7, window_bounds = array<i64: 1, 32>}, {pipeline_mode = #tpu.pipeline_mode<synchronous>, transform_indices = @transform_8, window_bounds = array<i64: 1, 32>}, {pipeline_mode = #tpu.pipeline_mode<synchronous>, transform_indices = @transform_9, window_bounds = array<i64: 1, 32>}, {pipeline_mode = #tpu.pipeline_mode<synchronous>, transform_indices = @transform_10, window_bounds = array<i64: 1, 32>}, {pipeline_mode = #tpu.pipeline_mode<synchronous>, transform_indices = @transform_11, window_bounds = array<i64: 1, 32>}, {transform_indices = @transform_12, window_bounds = array<i64: 2, 4>}]} {
    %c0 = arith.constant 0 : index
    %c0_0 = arith.constant 0 : index
    %c0_1 = arith.constant 0 : index
    %0 = vector.load %arg1[%c0, %c0_0, %c0_1] : memref<2x8x32xbf16, #tpu.memory_space<vmem>>, vector<2x8x32xbf16>
    %c0_2 = arith.constant 0 : index
    %c0_3 = arith.constant 0 : index
    %c0_4 = arith.constant 0 : index
    %1 = vector.load %arg2[%c0_2, %c0_3, %c0_4] : memref<2x4x32xbf16, #tpu.memory_space<vmem>>, vector<2x4x32xbf16>
    %2 = vector.shape_cast %1 : vector<2x4x32xbf16> to vector<8x32xbf16>
    %c0_5 = arith.constant 0 : index
    %c0_6 = arith.constant 0 : index
    %3 = vector.load %arg5[%c0_5, %c0_6] : memref<32x32xbf16, #tpu.memory_space<vmem>>, vector<32x32xbf16>
    %cst = arith.constant dense<0.000000e+00> : vector<8x32xf32>
    %4 = tpu.matmul %2, %3, %cst {dimension_numbers = #tpu.dot_dimension_numbers<[1], [0], [0], [1], [0, 0, 1, 1], [], []>} : vector<8x32xbf16>, vector<32x32xbf16>, vector<8x32xf32> -> vector<8x32xf32>
    %5 = vector.shape_cast %4 : vector<8x32xf32> to vector<2x4x32xf32>
    %6 = arith.truncf %5 : vector<2x4x32xf32> to vector<2x4x32xbf16>
    %cst_7 = arith.constant dense<0.000000e+00> : vector<2x4x8xf32>
    %7 = tpu.matmul %6, %0, %cst_7 {dimension_numbers = #tpu.dot_dimension_numbers<[2], [2], [1], [1], [0, 0, 0, 1, 1, 1], [0], [0]>} : vector<2x4x32xbf16>, vector<2x8x32xbf16>, vector<2x4x8xf32> -> vector<2x4x8xf32>
    %c0_8 = arith.constant 0 : index
    %c0_9 = arith.constant 0 : index
    %8 = vector.load %arg8[%c0_8, %c0_9] : memref<1x32xf32, #tpu.memory_space<vmem>>, vector<1x32xf32>
    %9 = vector.shape_cast %8 : vector<1x32xf32> to vector<1x1x32xf32>
    %10 = arith.extf %1 : vector<2x4x32xbf16> to vector<2x4x32xf32>
    %11 = vector.broadcast %9 : vector<1x1x32xf32> to vector<2x4x32xf32>
    %12 = arith.mulf %10, %11 : vector<2x4x32xf32>
    %cst_10 = arith.constant dense<0.000000e+00> : vector<2x4xf32>
    %13 = vector.multi_reduction <add>, %12, %cst_10 [2] : vector<2x4x32xf32> to vector<2x4xf32>
    %14 = vector.shape_cast %13 : vector<2x4xf32> to vector<2x4x1xf32>
    %15 = vector.broadcast %14 : vector<2x4x1xf32> to vector<2x4x8xf32>
    %16 = arith.addf %7, %15 : vector<2x4x8xf32>
    %c0_11 = arith.constant 0 : index
    %c0_12 = arith.constant 0 : index
    %c0_13 = arith.constant 0 : index
    %17 = vector.load %arg3[%c0_11, %c0_12, %c0_13] : memref<2x1x8xf32, #tpu.memory_space<vmem>>, vector<2x1x8xf32>
    %18 = vector.broadcast %17 : vector<2x1x8xf32> to vector<2x4x8xf32>
    %19 = arith.addf %16, %18 : vector<2x4x8xf32>
    %cst_14 = arith.constant dense<0xFF800000> : vector<2x4xf32>
    %20 = vector.multi_reduction <maximumf>, %19, %cst_14 [2] : vector<2x4x8xf32> to vector<2x4xf32>
    %21 = vector.shape_cast %20 : vector<2x4xf32> to vector<2x4x1xf32>
    %22 = vector.broadcast %21 : vector<2x4x1xf32> to vector<2x4x8xf32>
    %23 = arith.subf %19, %22 : vector<2x4x8xf32>
    %24 = math.exp %23 : vector<2x4x8xf32>
    %cst_15 = arith.constant dense<0.000000e+00> : vector<2x4xf32>
    %25 = vector.multi_reduction <add>, %24, %cst_15 [2] : vector<2x4x8xf32> to vector<2x4xf32>
    %26 = vector.shape_cast %25 : vector<2x4xf32> to vector<2x4x1xf32>
    %27 = tpu.reciprocal %26 {approx = true} : vector<2x4x1xf32> -> vector<2x4x1xf32>
    %28 = vector.broadcast %27 : vector<2x4x1xf32> to vector<2x4x8xf32>
    %29 = arith.mulf %24, %28 : vector<2x4x8xf32>
    %30 = arith.truncf %29 : vector<2x4x8xf32> to vector<2x4x8xbf16>
    %cst_16 = arith.constant dense<0.000000e+00> : vector<2x4x32xf32>
    %31 = tpu.matmul %30, %0, %cst_16 {dimension_numbers = #tpu.dot_dimension_numbers<[2], [1], [1], [2], [0, 0, 0, 1, 1, 2], [0], [0]>} : vector<2x4x8xbf16>, vector<2x8x32xbf16>, vector<2x4x32xf32> -> vector<2x4x32xf32>
    %32 = vector.shape_cast %31 : vector<2x4x32xf32> to vector<8x32xf32>
    %33 = arith.truncf %32 : vector<8x32xf32> to vector<8x32xbf16>
    %c0_17 = arith.constant 0 : index
    %c0_18 = arith.constant 0 : index
    %34 = vector.load %arg6[%c0_17, %c0_18] : memref<32x32xbf16, #tpu.memory_space<vmem>>, vector<32x32xbf16>
    %cst_19 = arith.constant dense<0.000000e+00> : vector<8x32xf32>
    %35 = tpu.matmul %33, %34, %cst_19 {dimension_numbers = #tpu.dot_dimension_numbers<[1], [0], [0], [1], [0, 0, 1, 1], [], []>} : vector<8x32xbf16>, vector<32x32xbf16>, vector<8x32xf32> -> vector<8x32xf32>
    %c0_20 = arith.constant 0 : index
    %c0_21 = arith.constant 0 : index
    %36 = vector.load %arg9[%c0_20, %c0_21] : memref<1x32xf32, #tpu.memory_space<vmem>>, vector<1x32xf32>
    %37 = vector.broadcast %36 : vector<1x32xf32> to vector<8x32xf32>
    %38 = arith.addf %35, %37 : vector<8x32xf32>
    %39 = math.tanh %38 : vector<8x32xf32>
    %c0_22 = arith.constant 0 : index
    %c0_23 = arith.constant 0 : index
    %40 = vector.load %arg7[%c0_22, %c0_23] : memref<32x32xbf16, #tpu.memory_space<vmem>>, vector<32x32xbf16>
    %cst_24 = arith.constant dense<0.000000e+00> : vector<8x32xf32>
    %41 = tpu.matmul %2, %40, %cst_24 {dimension_numbers = #tpu.dot_dimension_numbers<[1], [0], [0], [1], [0, 0, 1, 1], [], []>} : vector<8x32xbf16>, vector<32x32xbf16>, vector<8x32xf32> -> vector<8x32xf32>
    %c0_25 = arith.constant 0 : index
    %c0_26 = arith.constant 0 : index
    %42 = vector.load %arg10[%c0_25, %c0_26] : memref<1x32xf32, #tpu.memory_space<vmem>>, vector<1x32xf32>
    %43 = vector.broadcast %42 : vector<1x32xf32> to vector<8x32xf32>
    %44 = arith.addf %41, %43 : vector<8x32xf32>
    %45 = math.tanh %44 : vector<8x32xf32>
    %46 = vector.shape_cast %39 : vector<8x32xf32> to vector<2x4x32xf32>
    %47 = vector.shape_cast %45 : vector<8x32xf32> to vector<2x4x32xf32>
    %c0_27 = arith.constant 0 : index
    %c0_28 = arith.constant 0 : index
    %48 = vector.load %arg11[%c0_27, %c0_28] : memref<1x32xf32, #tpu.memory_space<vmem>>, vector<1x32xf32>
    %49 = vector.shape_cast %48 : vector<1x32xf32> to vector<1x1x32xf32>
    %50 = vector.broadcast %49 : vector<1x1x32xf32> to vector<2x4x32xf32>
    %51 = arith.mulf %46, %50 : vector<2x4x32xf32>
    %cst_29 = arith.constant dense<0.000000e+00> : vector<2x4xf32>
    %52 = vector.multi_reduction <add>, %51, %cst_29 [2] : vector<2x4x32xf32> to vector<2x4xf32>
    %c0_30 = arith.constant 0 : index
    %c0_31 = arith.constant 0 : index
    %53 = vector.load %arg12[%c0_30, %c0_31] : memref<1x32xf32, #tpu.memory_space<vmem>>, vector<1x32xf32>
    %54 = vector.shape_cast %53 : vector<1x32xf32> to vector<1x1x32xf32>
    %55 = vector.broadcast %54 : vector<1x1x32xf32> to vector<2x4x32xf32>
    %56 = arith.mulf %47, %55 : vector<2x4x32xf32>
    %cst_32 = arith.constant dense<0.000000e+00> : vector<2x4xf32>
    %57 = vector.multi_reduction <add>, %56, %cst_32 [2] : vector<2x4x32xf32> to vector<2x4xf32>
    %58 = arith.addf %52, %57 : vector<2x4xf32>
    %c0_33 = arith.constant 0 : index
    %c0_34 = arith.constant 0 : index
    %c0_35 = arith.constant 0 : index
    %59 = vector.load %arg4[%c0_33, %c0_34, %c0_35] : memref<2x1x4xf32, #tpu.memory_space<vmem>>, vector<2x1x4xf32>
    %60 = vector.shape_cast %59 : vector<2x1x4xf32> to vector<2x4xf32>
    %61 = arith.addf %58, %60 : vector<2x4xf32>
    %c0_36 = arith.constant 0 : index
    %c0_37 = arith.constant 0 : index
    %62 = vector.load %arg13[%c0_36, %c0_37] : memref<2x4xf32, #tpu.memory_space<vmem>>, vector<2x4xf32>
    tpu.vector_store %arg13[%c0_36, %c0_37], %61 {strides = array<i32>} : memref<2x4xf32, #tpu.memory_space<vmem>>, vector<2x4xf32>,
    return
  }
  func.func @transform_0(%arg0: i32) -> (i32, i32, i32) {
    %c0_i32 = arith.constant 0 : i32
    %c0_i32_0 = arith.constant 0 : i32
    %c0_i32_1 = arith.constant 0 : i32
    return %arg0, %c0_i32, %c0_i32_0 : i32, i32, i32
  }
  func.func @transform_1(%arg0: i32) -> (i32, i32, i32) {
    %c0_i32 = arith.constant 0 : i32
    %c0_i32_0 = arith.constant 0 : i32
    %c0_i32_1 = arith.constant 0 : i32
    return %arg0, %c0_i32, %c0_i32_0 : i32, i32, i32
  }
  func.func @transform_2(%arg0: i32) -> (i32, i32, i32) {
    %c0_i32 = arith.constant 0 : i32
    %c0_i32_0 = arith.constant 0 : i32
    %c0_i32_1 = arith.constant 0 : i32
    return %arg0, %c0_i32, %c0_i32_0 : i32, i32, i32
  }
  func.func @transform_3(%arg0: i32) -> (i32, i32, i32) {
    %c0_i32 = arith.constant 0 : i32
    %c0_i32_0 = arith.constant 0 : i32
    %c0_i32_1 = arith.constant 0 : i32
    return %arg0, %c0_i32, %c0_i32_0 : i32, i32, i32
  }
  func.func @transform_4(%arg0: i32) -> (i32, i32) {
    %c0_i32 = arith.constant 0 : i32
    %c0_i32_0 = arith.constant 0 : i32
    %c0_i32_1 = arith.constant 0 : i32
    return %c0_i32, %c0_i32_0 : i32, i32
  }
  func.func @transform_5(%arg0: i32) -> (i32, i32) {
    %c0_i32 = arith.constant 0 : i32
    %c0_i32_0 = arith.constant 0 : i32
    %c0_i32_1 = arith.constant 0 : i32
    return %c0_i32, %c0_i32_0 : i32, i32
  }
  func.func @transform_6(%arg0: i32) -> (i32, i32) {
    %c0_i32 = arith.constant 0 : i32
    %c0_i32_0 = arith.constant 0 : i32
    %c0_i32_1 = arith.constant 0 : i32
    return %c0_i32, %c0_i32_0 : i32, i32
  }
  func.func @transform_7(%arg0: i32) -> (i32, i32) {
    %c0_i32 = arith.constant 0 : i32
    %c0_i32_0 = arith.constant 0 : i32
    %c0_i32_1 = arith.constant 0 : i32
    return %c0_i32, %c0_i32_0 : i32, i32
  }
  func.func @transform_8(%arg0: i32) -> (i32, i32) {
    %c0_i32 = arith.constant 0 : i32
    %c0_i32_0 = arith.constant 0 : i32
    %c0_i32_1 = arith.constant 0 : i32
    return %c0_i32, %c0_i32_0 : i32, i32
  }
  func.func @transform_9(%arg0: i32) -> (i32, i32) {
    %c0_i32 = arith.constant 0 : i32
    %c0_i32_0 = arith.constant 0 : i32
    %c0_i32_1 = arith.constant 0 : i32
    return %c0_i32, %c0_i32_0 : i32, i32
  }
  func.func @transform_10(%arg0: i32) -> (i32, i32) {
    %c0_i32 = arith.constant 0 : i32
    %c0_i32_0 = arith.constant 0 : i32
    %c0_i32_1 = arith.constant 0 : i32
    return %c0_i32, %c0_i32_0 : i32, i32
  }
  func.func @transform_11(%arg0: i32) -> (i32, i32) {
    %c0_i32 = arith.constant 0 : i32
    %c0_i32_0 = arith.constant 0 : i32
    %c0_i32_1 = arith.constant 0 : i32
    return %c0_i32, %c0_i32_0 : i32, i32
  }
  func.func @transform_12(%arg0: i32) -> (i32, i32) {
    %c0_i32 = arith.constant 0 : i32
    %c0_i32_0 = arith.constant 0 : i32
    return %arg0, %c0_i32 : i32, i32
  }
}

</mosaic_0001>

<bundles_post_ra>
// kernel: tpu_custom_call.1
= control target key start
LH: loop header
LB: loop body
LE: loop exit
PB: predicated region body
PF: predicated region fallthrough
CT: control target
= control target key end

     0   :  { %17 = vsyncpa [#allocation3], 0  ;;  %s1178_s0 = inlined_call_operand.hbm [shape: bf16[2,8,32], index: 0, kind: input, shape index: {}]   ;;  %s1179_s1 = inlined_call_operand.hbm [shape: bf16[2,4,32], index: 1, kind: input, shape index: {}]   ;;  %s1180_s2 = inlined_call_operand.vmem [shape: f32[2,1,8], index: 2, kind: input, shape index: {}]   ;;  %s1181_s3 = inlined_call_operand.hbm [shape: f32[2,1,4], index: 3, kind: input, shape index: {}]   ;;  %s1182_s4 = inlined_call_operand.hbm [shape: bf16[32,32], index: 4, kind: input, shape index: {}]   ;;  %s1183_s5 = inlined_call_operand.vmem [shape: bf16[32,32], index: 5, kind: input, shape index: {}]   ;;  %s1184_s6 = inlined_call_operand.hbm [shape: bf16[32,32], index: 6, kind: input, shape index: {}]   ;;  %s1185_s7 = inlined_call_operand.vmem [shape: f32[1,32], index: 7, kind: input, shape index: {}]   ;;  %s1186_s8 = inlined_call_operand.vmem [shape: f32[1,32], index: 8, kind: input, shape index: {}]   ;;  %s1187_s9 = inlined_call_operand.vmem [shape: f32[1,32], index: 9, kind: input, shape index: {}]   ;;  %s1188_s10 = inlined_call_operand.vmem [shape: f32[1,32], index: 10, kind: input, shape index: {}]   ;;  %s1189_s11 = inlined_call_operand.vmem [shape: f32[1,32], index: 11, kind: input, shape index: {}]   ;;  %s1190_s12 = inlined_call_operand.hbm [shape: f32[2,4], index: 12, kind: output, shape index: {}]  }
   0x1   :  { %18 = vsyncpa [#allocation6], 0 }
   0x2   :  { %19 = vsyncpa [#allocation9], 0 }
   0x3   :  { %20 = vsyncpa [#allocation4], 0  ;;  %s932_s21 = smov [#allocation5]   ;;  %s792_s25 = scalar_lea.hbm %s1179_s1, 64 }
   0x4   :  { %s38_s22 = sshll.u32 %s932_s21, 4  ;;  %p793_p0 = scmp.ne.s32.totalorder %s1179_s1, %s792_s25  ;;  %s39_s22 = int_to_ptr.vmem [resolvable:$true] %s38_s22 }
   0x5   :  { %p796_p1 = scmp.lt.u32.totalorder %s792_s25, %s1179_s1 }
   0x7   :  { %p798_p2 = pnand %p796_p1, %p793_p0 }
   0x9   :  { %801 = shalt.err (!%p798_p2)
}
   0xa   :  { %s802_s30 = scalar_lea.vmem %s39_s22, 64  ;;  %p807_p4 = scmp.lt.s32.totalorder %s39_s22, %s39_s22 }
   0xb   :  { %p803_p3 = scmp.ne.s32.totalorder %s39_s22, %s802_s30  ;;  %p808_p5 = scmp.lt.s32.totalorder %s802_s30, %s802_s30 }
   0xd   :  { %p809_p6 = por %p808_p5, %p807_p4 }
   0xf   :  { %p810_p7 = pnand %p809_p6, %p803_p3 }
  0x11   :  { %813 = shalt.err (!%p810_p7)
}
  0x12   :  { %s933_s13 = smov 32   ;;  %s934_s14 = smov 2  }
  0x13   :  { %44 = dma.hbm_to_vmem [thread:$0]  %s1179_s1, 64, %s39_s22, [#allocation6], %s933_s13, %s933_s13, %s934_s14  }
  0x14   :  { %s935_s17 = smov [#allocation8]   ;;  %s936_s19 = smov [#allocation2]  }
  0x15   :  { %s64_s18 = sshll.u32 %s935_s17, 4  ;;  %s26_s20 = sshll.u32 %s936_s19, 4  ;;  %s65_s18 = int_to_ptr.vmem [resolvable:$true] %s64_s18  ;;  %s27_s20 = int_to_ptr.vmem [resolvable:$true] %s26_s20 }
  0x16   :  { %s814_s24 = scalar_lea.hbm %s1182_s4, 256 }
  0x17   :  { %p815_p8 = scmp.ne.s32.totalorder %s1182_s4, %s814_s24  ;;  %p818_p9 = scmp.lt.u32.totalorder %s814_s24, %s1182_s4 }
  0x19   :  { %p820_p10 = pnand %p818_p9, %p815_p8 }
  0x1b   :  { %823 = shalt.err (!%p820_p10)
}
  0x1c   :  { %s824_s1 = scalar_lea.vmem %s65_s18, 256  ;;  %p829_p12 = scmp.lt.s32.totalorder %s65_s18, %s65_s18 }
  0x1d   :  { %p825_p11 = scmp.ne.s32.totalorder %s65_s18, %s824_s1  ;;  %p830_p13 = scmp.lt.s32.totalorder %s824_s1, %s824_s1 }
  0x1f   :  { %p831_p0 = por %p830_p13, %p829_p12 }
  0x21   :  { %p832_p1 = pnand %p831_p0, %p825_p11 }
  0x23   :  { %835 = shalt.err (!%p832_p1)
}
  0x24   :  { %s937_s22 = smov 64   ;;  %s938_s29 = smov 4  }
  0x25   :  { %70 = dma.hbm_to_vmem [thread:$0]  %s1182_s4, 256, %s65_s18, [#allocation9], %s937_s22, %s937_s22, %s938_s29  }
  0x26   :  { %s836_s16 = scalar_lea.hbm %s1178_s0, 128 }
  0x27   :  { %p837_p2 = scmp.ne.s32.totalorder %s1178_s0, %s836_s16  ;;  %p840_p3 = scmp.lt.u32.totalorder %s836_s16, %s1178_s0 }
  0x29   :  { %p842_p4 = pnand %p840_p3, %p837_p2 }
  0x2b   :  { %845 = shalt.err (!%p842_p4)
}
  0x2c   :  { %s846_s24 = scalar_lea.vmem %s27_s20, 128  ;;  %p851_p6 = scmp.lt.s32.totalorder %s27_s20, %s27_s20 }
  0x2d   :  { %p847_p5 = scmp.ne.s32.totalorder %s27_s20, %s846_s24  ;;  %p852_p7 = scmp.lt.s32.totalorder %s846_s24, %s846_s24 }
  0x2f   :  { %p853_p8 = por %p852_p7, %p851_p6 }
  0x31   :  { %p854_p9 = pnand %p853_p8, %p847_p5 }
  0x33   :  { %857 = shalt.err (!%p854_p9)
}
  0x34   :  { %32 = dma.hbm_to_vmem [thread:$0]  %s1178_s0, 128, %s27_s20, [#allocation3], %s937_s22, %s937_s22, %s938_s29  }
  0x35   :  { %s939_s25 = smov [#allocation7]   ;;  %s858_s1 = scalar_lea.hbm %s1181_s3, 32 }
  0x36   :  { %s52_s26 = sshll.u32 %s939_s25, 4  ;;  %p859_p10 = scmp.ne.s32.totalorder %s1181_s3, %s858_s1  ;;  %s53_s26 = int_to_ptr.vmem [resolvable:$true] %s52_s26 }
  0x37   :  { %p862_p11 = scmp.lt.u32.totalorder %s858_s1, %s1181_s3 }
  0x39   :  { %p864_p12 = pnand %p862_p11, %p859_p10 }
  0x3b   :  { %867 = shalt.err (!%p864_p12)
}
  0x3c   :  { %s868_s16 = scalar_lea.vmem %s53_s26, 32  ;;  %p873_p0 = scmp.lt.s32.totalorder %s53_s26, %s53_s26 }
  0x3d   :  { %p869_p13 = scmp.ne.s32.totalorder %s53_s26, %s868_s16  ;;  %p874_p1 = scmp.lt.s32.totalorder %s868_s16, %s868_s16 }
  0x3f   :  { %p875_p2 = por %p874_p1, %p873_p0 }
  0x41   :  { %p876_p3 = pnand %p875_p2, %p869_p13 }
  0x43   :  { %879 = shalt.err (!%p876_p3)
}
  0x44   :  { %s940_s0 = smov 16   ;;  %s941_s20 = smov 1  }
  0x45   :  { %58 = dma.hbm_to_vmem [thread:$0]  %s1181_s3, 32, %s53_s26, [#allocation6], %s940_s0, %s940_s0, %s941_s20  }
  0x46   :  { %s942_s21 = smov [#allocation10]   ;;  %s880_s18 = scalar_lea.hbm %s1184_s6, 256 }
  0x47   :  { %s78_s23 = sshll.u32 %s942_s21, 4  ;;  %p881_p4 = scmp.ne.s32.totalorder %s1184_s6, %s880_s18  ;;  %s79_s23 = int_to_ptr.vmem [resolvable:$true] %s78_s23 }
  0x48   :  { %p884_p5 = scmp.lt.u32.totalorder %s880_s18, %s1184_s6 }
  0x4a   :  { %p886_p6 = pnand %p884_p5, %p881_p4 }
  0x4c   :  { %889 = shalt.err (!%p886_p6)
}
  0x4d   :  { %s890_s30 = scalar_lea.vmem %s79_s23, 256  ;;  %p895_p8 = scmp.lt.s32.totalorder %s79_s23, %s79_s23 }
  0x4e   :  { %p891_p7 = scmp.ne.s32.totalorder %s79_s23, %s890_s30  ;;  %p896_p9 = scmp.lt.s32.totalorder %s890_s30, %s890_s30 }
  0x50   :  { %p897_p10 = por %p896_p9, %p895_p8 }
  0x52   :  { %p898_p11 = pnand %p897_p10, %p891_p7 }
  0x54   :  { %901 = shalt.err (!%p898_p11)
}
  0x55   :  { %84 = dma.hbm_to_vmem [thread:$0]  %s1184_s6, 256, %s79_s23, [#allocation9], %s937_s22, %s937_s22, %s938_s29  }
  0x56   :  { %924 = dma.done.wait [#allocation3], 128  }
  0x57   :  { %925 = vsyncadd [#allocation3], 4294967168 }
  0x58   :  { %926 = dma.done.wait [#allocation6], 96  }
  0x59   :  { %927 = vsyncadd [#allocation6], 4294967200 }
  0x5a   :  { %928 = dma.done.wait [#allocation9], 512  }
  0x5b   :  { %929 = vsyncadd [#allocation9], 4294966784  ;;  %v125_v0 = vlaneseq  ;;  %v943_v1 = vmov 0.0   ;;  %vm944_vm0 = vmmov 0   ;;  %v945_v2 = vmov 1983009808  }
  0x5c   :  { %708 = vmatprep.subr.bf16.mxu0 %v943_v1  ;;  %712 = vmatprep.mubr.msk.bf16.mxu0 %vm944_vm0, %v943_v1  ;;  %v123_v3 = vunpack.c.l.s4 %v945_v2  ;;  %v774_v6 = vld [vmem:[#allocation8] sm:$0xff]   ;;  %v775_v7 = vld [vmem:[#allocation8 + $0x8] sm:$0xff]   ;;  %vm141_vm1 = vcmask 261120   ;;  %v113_v9 = vld [vmem:[#allocation5] sm:$0x3]  ;;  %vm201_vm2 = vcmask 257024  }
  0x5d   :  { %716 = vmatprep.subr.bf16.mxu1 %v943_v1  ;;  %718 = vmatprep.mubr.msk.bf16.mxu1 %vm944_vm0, %v943_v1  ;;  %v1089_v5 = vshrl.u32 %v125_v0, 7  ;;  %v114_v10 = vld [vmem:[#allocation5 + $0x2] sm:$0x3]  ;;  %v111_v11 = vld [vmem:[#allocation2] sm:$0xf]  ;;  %v191_v18 = vunpack.c.l.bf16 %v113_v9  ;;  %vm345_vm3 = vcmask 1043456  }
  0x5e   :  { %v124_v4 = vunpack.c.0.s8 %v123_v3  ;;  %709 = vmatpush3.bf16.msra.mxu0 %v774_v6  ;;  %v121_v12 = vcombine.low %v113_v9, %v114_v10  ;;  %v212_v13 = vsel %vm141_vm1, %v111_v11, 0  ;;  %v1100_v15 = vld [vmem:[#allocation2 + $0x4] sm:$0xf]  ;;  %v672_v17 = vld [vmem:[%s1185_s7] ss:$0 sm:$0xff]  ;;  %v192_v19 = vunpack.c.l.bf16 %v114_v10 }
  0x5f   :  { %710 = vmatprep.subr.bf16.mxu0 %v943_v1  ;;  %717 = vmatpush3.bf16.xpose.msra.mxu1 %v212_v13  ;;  %v258_v16 = vsel %vm141_vm1, %v1100_v15, 0  ;;  %v199_v20 = vmul.f32 %v672_v17, %v191_v18  ;;  %v346_v25 = vsel %vm345_vm3, %v111_v11, 0  ;;  %v675_v35 = vld [vmem:[%s1180_s2] ss:$0 sm:$0xff]  ;;  %vm316_vm4 = vcmask 60416   ;;  %v777_v9 = vld [vmem:[#allocation10 + $0x8] sm:$0xff]  }
  0x60   :  { %v127_v8 = vsub.s32 %v124_v4, %v1089_v5  ;;  %728 = vmatprep.subr.bf16.mxu1 %v943_v1  ;;  %v200_v21 = vmul.f32 %v672_v17, %v192_v19  ;;  %v676_v40 = vld [vmem:[%s1180_s2 + $0x1] ss:$0 sm:$0xff]  ;;  %v391_v60 = vsel %vm345_vm3, %v1100_v15, 0  ;;  %vm341_vm5 = vcmask 64512   ;;  %v779_v11 = vld [vmem:[%s1183_s5 + $0x8] sm:$0xff]  }
  0x61   :  { %v202_v22 = vsel %vm201_vm2, %v199_v20, 0.0  ;;  %v778_v10 = vld [vmem:[%s1183_s5] sm:$0xff]   ;;  %vm647_vm6 = vcmask 1041409   ;;  %vm650_vm7 = vcmask 25600  }
  0x62   :  { %v1094_v14 = vrot.slane %v121_v12, %v127_v8  ;;  %711 = vmatpush3.bf16.msra.mxu0 %v775_v7  ;;  %203 = vadd.xlane.f32.xlu0 %v202_v22  ;;  %v205_v23 = vsel %vm201_vm2, %v200_v21, 0.0  ;;  %v776_v7 = vld [vmem:[#allocation10] sm:$0xff]  }
  0x63   :  { %722 = vmatprep.subr.bf16.mxu0 %v943_v1 }
  0x65   :  { %713 = vmatmul.mubr.msk.bf16.vlgmr.msra.gmra.mrb[0].mxu0 %vm141_vm1, %v1094_v14 }
  0x66   :  { %724 = vmatprep.mubr.msk.bf16.mxu0 %vm944_vm0, %v943_v1  ;;  %206 = vadd.xlane.f32.xlu0 %v205_v23 }
  0x6b   :  { %723 = vmatpush3.bf16.xpose.msra.mxu0 %v258_v16 }
  0x6c   :  { %734 = vmatprep.subr.bf16.mxu0 %v943_v1 }
  0xef   :  { %v204_v32 = vpop.xlane.xlu0 %203 }
  0xf3   :  { %v207_v34 = vpop.xlane.xlu0 %206 }
 0x138   :  { %v179_v24 = vpop.f32.mrb[0].mxu0 }
 0x139   :  { %v186_v26 = vcombine.high %v179_v24, %v179_v24  ;;  %v188_v27 = vpack.c.bf16 %v179_v24, %v179_v24  ;;  %v714_v28 = vpop.f32.mrb[1].mxu0 }
 0x13a   :  { %v182_v29 = vpop.f32.mrb[2].mxu0  ;;  %v688_v28 = vld [vmem:[%s1189_s11] ss:$0 sm:$0xff] }
 0x13b   :  { %v189_v30 = vpack.c.bf16 %v186_v26, %v186_v26  ;;  %v715_v31 = vpop.f32.mrb[3].mxu0  ;;  %719 = vmatmul.mubr.msk.bf16.vlgmr.msra.gmra.mrb[0].mxu1 %vm141_vm1, %v188_v27 }
 0x13c   :  { %729 = vmatpush3.bf16.msra.mxu1 %v346_v25  ;;  %730 = vmatprep.mubr.msk.bf16.mxu1 %vm944_vm0, %v943_v1  ;;  %v683_v25 = vld [vmem:[%s1187_s9] ss:$0 sm:$0xff] }
 0x13d   :  { %725 = vmatmul.mubr.msk.bf16.vlgmr.msra.gmra.mrb[4].mxu0 %vm141_vm1, %v189_v30  ;;  %740 = vmatprep.subr.bf16.mxu1 %v943_v1 }
 0x13e   :  { %736 = vmatprep.mubr.msk.bf16.mxu0 %vm944_vm0, %v943_v1  ;;  %735 = vmatpush3.bf16.msra.mxu0 %v391_v60  ;;  %v638_v60 = vand.u32 127, %v125_v0 }
 0x13f   :  { %748 = vmatprep.subr.bf16.mxu0 %v943_v1 }
 0x20e   :  { %v248_v33 = vpop.f32.mrb[0].mxu1 }
 0x20f   :  { %v249_v36 = vadd.f32 %v248_v33, %v204_v32  ;;  %v720_v37 = vpop.f32.mrb[1].mxu1 }
 0x210   :  { %v251_v38 = vpop.f32.mrb[2].mxu1  ;;  %v294_v39 = vpop.f32.mrb[4].mxu0 }
 0x211   :  { %v295_v41 = vadd.f32 %v294_v39, %v207_v34  ;;  %v721_v42 = vpop.f32.mrb[3].mxu1  ;;  %v726_v43 = vpop.f32.mrb[5].mxu0  ;;  %v314_v44 = vadd.f32 %v675_v35, %v249_v36  ;;  %v679_v34 = vld [vmem:[%s1186_s8] ss:$0 sm:$0xff]  ;;  %s947_s8 = smov [#allocation11]  }
 0x212   :  { %v297_v45 = vpop.f32.mrb[6].mxu0 }
 0x213   :  { %v727_v46 = vpop.f32.mrb[7].mxu0  ;;  %v317_v47 = vsel %vm316_vm4, %v314_v44, -inf  ;;  %v315_v48 = vadd.f32 %v676_v40, %v295_v41  ;;  %v687_v40 = vld [vmem:[%s1188_s10] ss:$0 sm:$0xff]  ;;  %s658_s10 = sshll.u32 %s947_s8, 4  ;;  %s659_s10 = int_to_ptr.vmem [resolvable:$true] %s658_s10 }
 0x214   :  { %318 = vmax.xlane.f32.xlu1 %v317_v47  ;;  %v690_v47 = vld [vmem:[#allocation7 + $0x1] ss:$0 sm:$0xff]  ;;  %s902_s24 = scalar_lea.vmem %s659_s10, 32  ;;  %p907_p13 = scmp.lt.s32.totalorder %s659_s10, %s659_s10 }
 0x215   :  { %v320_v49 = vsel %vm316_vm4, %v315_v48, -inf  ;;  %p903_p12 = scmp.ne.s32.totalorder %s659_s10, %s902_s24  ;;  %p908_p0 = scmp.lt.s32.totalorder %s902_s24, %s902_s24 }
 0x217   :  { %p909_p1 = por %p908_p0, %p907_p13 }
 0x218   :  { %321 = vmax.xlane.f32.xlu1 %v320_v49  ;;  %v946_v49 = vmov 0  }
 0x219   :  { %773 = vset.pattern.permute.xlu0 %v946_v49  ;;  %772 = vset.pattern.permute.xlu1 %v946_v49  ;;  %p910_p2 = pnand %p909_p1, %p903_p12 }
 0x2a1   :  { %v319_v50 = vpop.xlane.xlu1 %318 }
 0x2a2   :  { %v323_v51 = vsub.f32 %v314_v44, %v319_v50 }
 0x2a4   :  { %v325_v52 = vmul.f32 1.442695, %v323_v51 }
 0x2a5   :  { %v322_v53 = vpop.xlane.xlu1 %321 }
 0x2a6   :  { %780 = vpow2.f32 %v325_v52  ;;  %v324_v54 = vsub.f32 %v315_v48, %v322_v53  ;;  %v689_v48 = vld [vmem:[#allocation7] ss:$0 sm:$0xff] }
 0x2a8   :  { %v327_v55 = vmul.f32 1.442695, %v324_v54 }
 0x2aa   :  { %782 = vpow2.f32 %v327_v55 }
 0x2b0   :  { %v781_v56 = vpop.eup %780 }
 0x2b1   :  { %v329_v57 = vsel %vm316_vm4, %v781_v56, 0.0 }
 0x2b2   :  { %330 = vadd.xlane.f32.xlu0 %v329_v57 }
 0x2b4   :  { %v783_v58 = vpop.eup %782 }
 0x2b5   :  { %v332_v59 = vsel %vm316_vm4, %v783_v58, 0.0 }
 0x2b6   :  { %333 = vadd.xlane.f32.xlu1 %v332_v59 }
 0x33f   :  { %v331_v61 = vpop.xlane.xlu0 %330 }
 0x340   :  { %784 = vrcp.f32 %v331_v61 }
 0x343   :  { %v334_v62 = vpop.xlane.xlu1 %333 }
 0x344   :  { %786 = vrcp.f32 %v334_v62  ;;  %v641_v62 = vsub.s32 %v638_v60, %v1089_v5 }
 0x34a   :  { %v785_v63 = vpop.eup %784 }
 0x34b   :  { %v337_v2 = vmul.f32 %v785_v63, %v781_v56 }
 0x34d   :  { %v339_v3 = vpack.c.bf16 %v337_v2, %v337_v2 }
 0x34e   :  { %v787_v4 = vpop.eup %786 }
 0x34f   :  { %v338_v6 = vmul.f32 %v787_v4, %v783_v58  ;;  %731 = vmatmul.mubr.msk.bf16.vlgmr.msra.gmra.mrb[4].mxu1 %vm341_vm5, %v339_v3 }
 0x350   :  { %744 = vmatprep.mubr.msk.bf16.mxu1 %vm944_vm0, %v943_v1  ;;  %741 = vmatpush3.bf16.msra.mxu1 %v778_v10 }
 0x351   :  { %v340_v8 = vpack.c.bf16 %v338_v6, %v338_v6  ;;  %742 = vmatprep.subr.bf16.mxu1 %v943_v1 }
 0x353   :  { %737 = vmatmul.mubr.msk.bf16.vlgmr.msra.gmra.mrb[8].mxu0 %vm341_vm5, %v340_v8 }
 0x354   :  { %749 = vmatpush3.bf16.msra.mxu0 %v776_v7  ;;  %752 = vmatprep.mubr.msk.bf16.mxu0 %vm944_vm0, %v943_v1 }
 0x355   :  { %750 = vmatprep.subr.bf16.mxu0 %v943_v1  ;;  %743 = vmatpush3.bf16.msra.mxu1 %v779_v11 }
 0x358   :  { %751 = vmatpush3.bf16.msra.mxu0 %v777_v9 }
 0x35b   :  { %753 = vmatmul.mubr.msk.bf16.vlgmr.msra.gmra.mrb[12].mxu0 %vm141_vm1, %v1094_v14 }
 0x422   :  { %v382_v12 = vpop.f32.mrb[4].mxu1 }
 0x423   :  { %v732_v13 = vpop.f32.mrb[5].mxu1 }
 0x424   :  { %v385_v15 = vpop.f32.mrb[6].mxu1 }
 0x425   :  { %v733_v16 = vpop.f32.mrb[7].mxu1 }
 0x426   :  { %v427_v17 = vpop.f32.mrb[8].mxu0 }
 0x427   :  { %v435_v18 = vcombine.low %v382_v12, %v427_v17  ;;  %v738_v19 = vpop.f32.mrb[9].mxu0 }
 0x428   :  { %v430_v14 = vpop.f32.mrb[10].mxu0 }
 0x429   :  { %v437_v20 = vpack.c.bf16 %v435_v18, %v435_v18  ;;  %v739_v21 = vpop.f32.mrb[11].mxu0 }
 0x42b   :  { %745 = vmatmul.mubr.msk.bf16.vlgmr.msra.gmra.mrb[8].mxu1 %vm141_vm1, %v437_v20 }
 0x42e   :  { %v562_v22 = vpop.f32.mrb[12].mxu0 }
 0x42f   :  { %v754_v23 = vpop.f32.mrb[13].mxu0  ;;  %v563_v26 = vadd.f32 %v683_v25, %v562_v22 }
 0x430   :  { %v565_v1 = vpop.f32.mrb[14].mxu0 }
 0x431   :  { %v755_v24 = vpop.f32.mrb[15].mxu0  ;;  %788 = vtanh.f32 %v563_v26 }
 0x43b   :  { %v789_v27 = vpop.eup %788 }
 0x43c   :  { %v573_v29 = vcombine.high %v789_v27, %v789_v27  ;;  %v597_v30 = vmul.f32 %v789_v27, %v688_v28 }
 0x43e   :  { %v598_v31 = vmul.f32 %v688_v28, %v573_v29  ;;  %v599_v32 = vsel %vm201_vm2, %v597_v30, 0.0 }
 0x43f   :  { %600 = vadd.xlane.f32.xlu0 %v599_v32 }
 0x440   :  { %v602_v33 = vsel %vm201_vm2, %v598_v31, 0.0 }
 0x441   :  { %603 = vadd.xlane.f32.xlu1 %v602_v33 }
 0x4cc   :  { %v601_v50 = vpop.xlane.xlu0 %600 }
 0x4ce   :  { %v604_v51 = vpop.xlane.xlu1 %603 }
 0x4fe   :  { %v498_v35 = vpop.f32.mrb[8].mxu1 }
 0x4ff   :  { %v499_v36 = vadd.f32 %v679_v34, %v498_v35  ;;  %v746_v37 = vpop.f32.mrb[9].mxu1 }
 0x500   :  { %v501_v38 = vpop.f32.mrb[10].mxu1 }
 0x501   :  { %790 = vtanh.f32 %v499_v36  ;;  %v747_v39 = vpop.f32.mrb[11].mxu1 }
 0x50b   :  { %v791_v41 = vpop.eup %790 }
 0x50c   :  { %v582_v42 = vmul.f32 %v791_v41, %v687_v40  ;;  %v570_v43 = vcombine.high %v791_v41, %v791_v41 }
 0x50e   :  { %v584_v44 = vsel %vm201_vm2, %v582_v42, 0.0  ;;  %v583_v45 = vmul.f32 %v687_v40, %v570_v43 }
 0x50f   :  { %585 = vadd.xlane.f32.xlu0 %v584_v44 }
 0x510   :  { %v587_v46 = vsel %vm201_vm2, %v583_v45, 0.0 }
 0x511   :  { %588 = vadd.xlane.f32.xlu1 %v587_v46 }
 0x522   :  { %623 = vbcast.lane.b32.xlu1 %v690_v47, 256 }
 0x525   :  { %620 = vbcast.lane.b32.xlu0 %v689_v48, 256 }
 0x59c   :  { %v586_v52 = vpop.xlane.xlu0 %585 }
 0x59d   :  { %v605_v54 = vadd.f32 %v601_v50, %v586_v52 }
 0x59e   :  { %v589_v53 = vpop.xlane.xlu1 %588 }
 0x59f   :  { %v606_v58 = vadd.f32 %v604_v51, %v589_v53 }
 0x5a0   :  { %v621_v55 = vpop.permute.xlu0 %620 }
 0x5a1   :  { %v627_v56 = vadd.f32 %v621_v55, %v605_v54 }
 0x5a2   :  { %v624_v57 = vpop.permute.xlu1 %623 }
 0x5a3   :  { %632 = vperm.xlu1 %772, %v627_v56   ;;  %v628_v59 = vadd.f32 %v624_v57, %v606_v58 }
 0x5a7   :  { %635 = vperm.xlu1 %772, %v628_v59  }
 0x622   :  { %v633_v61 = vpop.permute.xlu1 %632 }
 0x623   :  { %v642_v2 = vrot.slane %v633_v61, %v641_v62 }
 0x626   :  { %v636_v63 = vpop.permute.xlu1 %635 }
 0x627   :  { %v646_v3 = vrot.slane %v636_v63, %v641_v62 }
 0x629   :  { %v648_v4 = vsel %vm647_vm6, %v646_v3, %v642_v2 }
 0x62a   :  { %651 = vst.msk [vmem:[#allocation11] sm:$0x3] %vm650_vm7, %v648_v4 }
 0x62b   :  { %913 = shalt.err (!%p910_p2)
}
 0x62c   :  { %s914_s25 = scalar_lea.hbm %s1190_s12, 32 }
 0x62d   :  { %p915_p3 = scmp.ne.s32.totalorder %s1190_s12, %s914_s25  ;;  %p918_p4 = scmp.lt.u32.totalorder %s914_s25, %s1190_s12 }
 0x62f   :  { %p920_p5 = pnand %p918_p4, %p915_p3 }
 0x631   :  { %923 = shalt.err (!%p920_p5)
}
 0x632   :  { %661 = dma.vmem_to_hbm [thread:$0]  %s659_s10, 32, %s1190_s12, [#allocation4]  }
 0x633   :  { %930 = dma.done.wait [#allocation4], 32  }
 0x634   :  { %931 = vsyncadd [#allocation4], 4294967264 }
 0x635   :  { %665 = vsyncpa [#allocation3], 1 }
 0x636   :  { %666 = vsyncpa [#allocation6], 1 }
 0x637   :  { %667 = vsyncpa [#allocation9], 1 }
 0x638   :  { %668 = vsyncpa [#allocation4], 1 }

</bundles_post_ra>
